<compile_context>
chip_gen: v6e
topology: v6e:2x2x1
jax: 0.10.0
libtpu: 0.0.40
codegen_flags: <defaults>
</compile_context>

<pallas_src>
import functools

import jax
import jax.numpy as jnp
from jax import lax
from jax.experimental import pallas as pl
from jax.experimental.pallas import tpu as pltpu


def _round_up(x, m):
    return ((x + m - 1) // m) * m


def _cdiv(a, b):
    return -(-a // b)


def _spiking_conv_kernel(xl_ref, xc_ref, xr_ref, w_ref, c_ref, o_ref,
                         xw_ref, im2col_ref, *,
                         H, W, KH, KW, C, CS, TL, HB, t_min, t_max):
    """One (batch image, spatial lane-tile) grid step.

    Refs (batch dim squeezed by the BlockSpecs):
      xl_ref     (C, HB)        lanes [t*TL - HB, t*TL) of the flattened image
      xc_ref     (C, TL)        lanes [t*TL, t*TL + TL)
      xr_ref     (C, HB)        lanes [t*TL + TL, t*TL + TL + HB)
      w_ref      (F, KPAD)      packed weights, KPAD = KH*KW*CS
      c_ref      (F, 1)         folded per-filter epilogue constant (f32)
      o_ref      (F, TL)        output tile (flattened spatial on lanes)
      xw_ref     (C, 2*HB+TL)   scratch: contiguous halo'd input window
      im2col_ref (KPAD, TL)     scratch: fused-matmul RHS (im2col columns)
    """
    L = H * W
    pad_h, pad_w = (KH - 1) // 2, (KW - 1) // 2
    t = pl.program_id(1)
    dtype = xc_ref.dtype
    t_min_v = jnp.asarray(t_min, dtype=dtype)

    # ---- 1. contiguous halo'd window (lane-aligned, full-width copies) ------
    xw_ref[:, 0:HB] = xl_ref[...]
    xw_ref[:, HB:HB + TL] = xc_ref[...]
    xw_ref[:, HB + TL:HB + TL + HB] = xr_ref[...]

    # ---- 2. hoisted per-tile masks, computed once ((1, TL) each) ------------
    lane = lax.broadcasted_iota(jnp.int32, (1, TL), 1)
    glane = lane + t * TL                 # global flattened output position
    col = glane % W                       # output column index
    row_masks, col_masks = {}, {}
    for dy in range(-pad_h, pad_h + 1):
        if dy < 0:
            row_masks[dy] = glane < (-dy) * W         # reads above the image
        elif dy > 0:
            row_masks[dy] = glane >= L - dy * W       # reads below the image
    for dx in range(-pad_w, pad_w + 1):
        if dx < 0:
            col_masks[dx] = col < (-dx)               # column wrap (left pad)
        elif dx > 0:
            col_masks[dx] = col >= W - dx             # column wrap (right pad)

    # ---- 3. im2col scratch: one CS-row block per tap, padding -> t_min ------
    for ky in range(KH):
        for kx in range(KW):
            dy, dx = ky - pad_h, kx - pad_w
            k = ky * KW + kx
            r0 = k * CS
            s = dy * W + dx                            # static shift, |s| <= HB
            win = xw_ref[:, HB + s:HB + s + TL]        # (C, TL) shifted window
            parts = [m for m in (row_masks.get(dy), col_masks.get(dx))
                     if m is not None]
            if parts:
                mask = parts[0] if len(parts) == 1 else jnp.logical_or(*parts)
                win = jnp.where(mask, t_min_v, win)    # 'same' padding value
            im2col_ref[r0:r0 + C, :] = win
            if CS > C:    # rows matching the zero-padded weight columns
                im2col_ref[r0 + C:r0 + CS, :] = jnp.zeros((CS - C, TL), dtype)

    # ---- 4. single fused MXU matmul + folded epilogue ------------------------
    acc = jnp.dot(w_ref[...], im2col_ref[...],
                  preferred_element_type=jnp.float32)            # (F, TL)
    ti = acc + c_ref[...]
    # == torch.where(ti < t_max, ti, t_max) for finite ti (module makes no NaNs)
    o_ref[...] = jnp.minimum(ti, jnp.float32(t_max)).astype(o_ref.dtype)


def spiking_conv2d_forward(tj, kernel, bias, d_i, t_min=0.0, t_max=1.0,
                           operand_dtype=jnp.float32, out_dtype=jnp.float32,
                           tile_lanes=2048,
                           vmem_budget_bytes=40 * 1024 * 1024):
    """tj: (B, C, H, W) f32; kernel: (F, C, KH, KW); bias: (F, 1); d_i: (9, F).

    operand_dtype: dtype of the activation/weight operands fed to the MXU
      (jnp.bfloat16 recommended on v6e/v7x; accumulation & epilogue stay f32).
    tile_lanes: target spatial tile width (rounded to the halo-block size);
      sweep per TPU generation, auto-shrunk to fit `vmem_budget_bytes`.
    """
    B, C, H, W = tj.shape
    F, Ck, KH, KW = kernel.shape
    assert Ck == C
    assert KH % 2 == 1 and KW % 2 == 1, "padding='same', stride=1 path only"
    t_min, t_max = float(t_min), float(t_max)
    pad_h, pad_w = (KH - 1) // 2, (KW - 1) // 2
    L = H * W

    # ---- lane tiling: HB (halo block) and TL (output tile), 128-multiples ----
    HB = _round_up(pad_h * W + pad_w, 128)        # covers the max |lane shift|
    LHB = _cdiv(L, HB)                            # number of HB blocks over L
    CS = _round_up(C, 8)                          # per-tap sublane stride
    KPAD = KH * KW * CS
    op_isz = jnp.dtype(operand_dtype).itemsize
    out_isz = jnp.dtype(out_dtype).itemsize

    tiles = max(1, min(max(tile_lanes // HB, 1), LHB))
    while True:
        TL = tiles * HB
        vmem_est = (2 * ((C * TL + 2 * C * HB + F * KPAD) * op_isz
                         + F * 4 + F * TL * out_isz)
                    + (C * (TL + 2 * HB) + KPAD * TL) * op_isz)
        if vmem_est <= vmem_budget_bytes or tiles == 1:
            break
        tiles = max(1, tiles // 2)
    nT = _cdiv(L, TL)
    R = TL // HB

    # ---- host-side prep (reshape is layout-free; no padded activation copy) --
    x = tj.reshape(B, C, L).astype(operand_dtype)

    # Packed weights: column (ky*KW+kx)*CS + c  <-  kernel[f, c, ky, kx];
    # columns [.. + C, .. + CS) are exact zeros (matching zeroed scratch rows).
    wt = jnp.transpose(kernel.astype(jnp.float32), (0, 2, 3, 1))   # (F,KH,KW,C)
    w_packed = jnp.zeros((F, KH * KW, CS), jnp.float32)
    w_packed = w_packed.at[:, :, :C].set(wt.reshape(F, KH * KW, C))
    w_packed = w_packed.reshape(F, KPAD).astype(operand_dtype)

    # Folded per-filter epilogue constant:
    #   (p - t_min)@W - B + (t_max - t_min - D_i[0]) + t_min
    #     = p@W + (t_max - D_i[0] - t_min*sum(W) - B)
    wsum = jnp.sum(kernel.astype(jnp.float32), axis=(1, 2, 3))             # (F,)
    const = (jnp.float32(t_max) - d_i[0].astype(jnp.float32)
             - jnp.float32(t_min) * wsum - bias[:, 0].astype(jnp.float32))
    const = const.reshape(F, 1)

    kern = functools.partial(_spiking_conv_kernel, H=H, W=W, KH=KH, KW=KW,
                             C=C, CS=CS, TL=TL, HB=HB,
                             t_min=t_min, t_max=t_max)

    cost = pl.CostEstimate(
        flops=2 * B * nT * F * KPAD * TL,
        transcendentals=0,
        bytes_accessed=B * nT * ((C * (TL + 2 * HB) + F * KPAD) * op_isz
                                 + F * 4 + F * TL * out_isz))

    vmem_limit = int(min(110 * 1024 * 1024,
                         max(32 * 1024 * 1024, vmem_est + vmem_est // 2)))

    out = pl.pallas_call(
        kern,
        out_shape=jax.ShapeDtypeStruct((B, F, nT * TL), out_dtype),
        grid=(B, nT),
        in_specs=[
            # left halo: lanes [t*TL - HB, t*TL); clamped to block 0 at t == 0
            # (the clamped data only feeds lanes that are masked to t_min).
            pl.BlockSpec((pl.Squeezed(), C, HB),
                         lambda b, t: (b, 0, jnp.maximum(t * R - 1, 0))),
            # center: lanes [t*TL, t*TL + TL)
            pl.BlockSpec((pl.Squeezed(), C, TL), lambda b, t: (b, 0, t)),
            # right halo: lanes [t*TL + TL, ...); clamped at the last tile.
            pl.BlockSpec((pl.Squeezed(), C, HB),
                         lambda b, t: (b, 0, jnp.minimum((t + 1) * R, LHB - 1))),
            pl.BlockSpec((F, KPAD), lambda b, t: (0, 0)),
            pl.BlockSpec((F, 1), lambda b, t: (0, 0)),
        ],
        out_specs=pl.BlockSpec((pl.Squeezed(), F, TL), lambda b, t: (b, 0, t)),
        scratch_shapes=[
            pltpu.VMEM((C, 2 * HB + TL), operand_dtype),   # halo'd window
            pltpu.VMEM((KPAD, TL), operand_dtype),         # im2col tile
        ],
        compiler_params=pltpu.CompilerParams(
            dimension_semantics=("parallel", "parallel"),
            vmem_limit_bytes=vmem_limit),
        cost_estimate=cost,
    )(x, x, x, w_packed, const)

    # Output is already channel-major: drop lane padding and reshape.
    return out[:, :, :L].reshape(B, F, H, W).astype(jnp.float32)
    # TODO(synk): noise > 0 path (torch.randn_like(ti) * noise) not implemented;
    # module default noise=0.0.


def _reference(tj, kernel, bias, d_i, t_min=0.0, t_max=1.0):
    """Pure-JAX f32 reference mirroring the PyTorch forward, for verification."""
    B, C, H, W = tj.shape
    F, _, KH, KW = kernel.shape
    pad = (KH - 1) // 2
    tj_p = jnp.pad(tj, ((0, 0), (0, 0), (pad, pad), (pad, pad)),
                   constant_values=float(t_min))
    patch_list = [tj_p[:, :, ky:ky + H, kx:kx + W]
                  for ky in range(KH) for kx in range(KW)]
    patches = jnp.stack(patch_list, axis=2).reshape(B, C * KH * KW, H * W)
    patches = jnp.transpose(patches, (0, 2, 1))
    patches = jnp.concatenate(
        [patches, jnp.full((B, H * W, 1), t_min - 1.0, jnp.float32)], axis=2)
    Wm = jnp.concatenate([kernel.reshape(F, -1).T, bias.T], axis=0)
    thr = t_max - t_min - d_i[0]
    ti = (patches - t_min) @ Wm + thr + t_min
    ti = jnp.where(ti < t_max, ti, jnp.float32(t_max))
    return jnp.transpose(ti, (0, 2, 1)).reshape(B, F, H, W)


if __name__ == "__main__":
    key = jax.random.PRNGKey(0)
    k_x, k_w, k_b, k_d, k_x2 = jax.random.split(key, 5)

    batch, in_ch, hw, filters, ksz = 2, 4, 16, 8, 3

    tj = jax.random.uniform(k_x, (batch, in_ch, hw, hw), dtype=jnp.float32)
    kernel = 0.2 * jax.random.normal(k_w, (filters, in_ch, ksz, ksz),
                                     dtype=jnp.float32)
    bias = 0.1 * jax.random.normal(k_b, (filters, 1), dtype=jnp.float32)
    d_i = jnp.zeros((9, filters), jnp.float32).at[0].set(
        0.05 * jax.random.normal(k_d, (filters,), dtype=jnp.float32))

    # 1) Default module params (t_min=0, t_max=1), f32 operands — exact check.
    out = jax.block_until_ready(
        spiking_conv2d_forward(tj, kernel, bias, d_i, t_min=0.0, t_max=1.0))
    ref = _reference(tj, kernel, bias, d_i, 0.0, 1.0)
    assert out.shape == (batch, filters, hw, hw)
    assert jnp.allclose(out, ref, atol=1e-4, rtol=1e-4)

    # 2) Non-default t_min/t_max (after set_params) — exercises the t_min fold
    #    and the in-kernel generation of the padding value.
    out2 = jax.block_until_ready(
        spiking_conv2d_forward(tj, kernel, bias, d_i, t_min=0.25, t_max=1.5))
    ref2 = _reference(tj, kernel, bias, d_i, 0.25, 1.5)
    assert jnp.allclose(out2, ref2, atol=1e-4, rtol=1e-4)

    # 3) Multi-tile spatial grid: small tile_lanes forces 3 lane tiles with a
    #    partial last tile — exercises the halo blocks, clamping and masks.
    hw2 = 24
    tj2 = jax.random.uniform(k_x2, (1, in_ch, hw2, hw2), dtype=jnp.float32)
    out3 = jax.block_until_ready(
        spiking_conv2d_forward(tj2, kernel, bias, d_i, t_min=0.0, t_max=1.0,
                               tile_lanes=256))
    ref3 = _reference(tj2, kernel, bias, d_i, 0.0, 1.0)
    assert out3.shape == (1, filters, hw2, hw2)
    assert jnp.allclose(out3, ref3, atol=1e-4, rtol=1e-4)

    # 4) bf16 operands (v6e/v7x MXU-friendly path), f32 accumulation/epilogue.
    out4 = jax.block_until_ready(
        spiking_conv2d_forward(tj, kernel, bias, d_i, t_min=0.0, t_max=1.0,
                               operand_dtype=jnp.bfloat16))
    assert jnp.allclose(out4, ref, atol=5e-2, rtol=5e-2)

    print("KERNEL_OK")
</pallas_src>

<mosaic_0001>
module attributes {stable_mosaic.version = 11 : i64} {
  func.func @_spiking_conv_kernel(%arg0: i32, %arg1: i32, %arg2: memref<1x4x128xf32, #tpu.memory_space<vmem>>, %arg3: memref<1x4x256xf32, #tpu.memory_space<vmem>>, %arg4: memref<1x4x128xf32, #tpu.memory_space<vmem>>, %arg5: memref<8x72xf32, #tpu.memory_space<vmem>>, %arg6: memref<8x1xf32, #tpu.memory_space<vmem>>, %arg7: memref<1x8x256xf32, #tpu.memory_space<vmem>>, %arg8: memref<4x512xf32, #tpu.memory_space<vmem>>, %arg9: memref<72x256xf32, #tpu.memory_space<vmem>>) attributes {dimension_semantics = [#tpu.dimension_semantics<parallel>, #tpu.dimension_semantics<parallel>], iteration_bounds = array<i64: 2, 1>, scalar_prefetch = 0 : i64, scratch_operands = 2 : i64, tpu.core_type = #tpu.core_type<tc>, window_params = [{transform_indices = @transform_0, window_bounds = array<i64: 1, 4, 128>}, {transform_indices = @transform_1, window_bounds = array<i64: 1, 4, 256>}, {transform_indices = @transform_2, window_bounds = array<i64: 1, 4, 128>}, {pipeline_mode = #tpu.pipeline_mode<synchronous>, transform_indices = @transform_3, window_bounds = array<i64: 8, 72>}, {pipeline_mode = #tpu.pipeline_mode<synchronous>, transform_indices = @transform_4, window_bounds = array<i64: 8, 1>}, {transform_indices = @transform_5, window_bounds = array<i64: 1, 8, 256>}]} {
    %c0 = arith.constant 0 : index
    %c0_0 = arith.constant 0 : index
    %c0_1 = arith.constant 0 : index
    %0 = vector.load %arg2[%c0, %c0_0, %c0_1] : memref<1x4x128xf32, #tpu.memory_space<vmem>>, vector<1x4x128xf32>
    %1 = vector.shape_cast %0 : vector<1x4x128xf32> to vector<4x128xf32>
    %c0_2 = arith.constant 0 : index
    %c0_3 = arith.constant 0 : index
    %2 = vector.load %arg8[%c0_2, %c0_3] : memref<4x512xf32, #tpu.memory_space<vmem>>, vector<4x128xf32>
    tpu.vector_store %arg8[%c0_2, %c0_3], %1 {strides = array<i32>} : memref<4x512xf32, #tpu.memory_space<vmem>>, vector<4x128xf32>,
    %c0_4 = arith.constant 0 : index
    %c0_5 = arith.constant 0 : index
    %c0_6 = arith.constant 0 : index
    %3 = vector.load %arg3[%c0_4, %c0_5, %c0_6] : memref<1x4x256xf32, #tpu.memory_space<vmem>>, vector<1x4x256xf32>
    %4 = vector.shape_cast %3 : vector<1x4x256xf32> to vector<4x256xf32>
    %c0_7 = arith.constant 0 : index
    %c128 = arith.constant 128 : index
    %5 = vector.load %arg8[%c0_7, %c128] : memref<4x512xf32, #tpu.memory_space<vmem>>, vector<4x256xf32>
    tpu.vector_store %arg8[%c0_7, %c128], %4 {strides = array<i32>} : memref<4x512xf32, #tpu.memory_space<vmem>>, vector<4x256xf32>,
    %c0_8 = arith.constant 0 : index
    %c0_9 = arith.constant 0 : index
    %c0_10 = arith.constant 0 : index
    %6 = vector.load %arg4[%c0_8, %c0_9, %c0_10] : memref<1x4x128xf32, #tpu.memory_space<vmem>>, vector<1x4x128xf32>
    %7 = vector.shape_cast %6 : vector<1x4x128xf32> to vector<4x128xf32>
    %c0_11 = arith.constant 0 : index
    %c384 = arith.constant 384 : index
    %8 = vector.load %arg8[%c0_11, %c384] : memref<4x512xf32, #tpu.memory_space<vmem>>, vector<4x128xf32>
    tpu.vector_store %arg8[%c0_11, %c384], %7 {strides = array<i32>} : memref<4x512xf32, #tpu.memory_space<vmem>>, vector<4x128xf32>,
    %9 = tpu.iota {dimensions = array<i32: 1>} : vector<1x256xi32>
    %c256_i32 = arith.constant 256 : i32
    %10 = arith.muli %arg1, %c256_i32 : i32
    %11 = vector.broadcast %10 : i32 to vector<1x256xi32>
    %12 = arith.addi %9, %11 : vector<1x256xi32>
    %c16_i32 = arith.constant 16 : i32
    %c0_i32 = arith.constant 0 : i32
    %13 = arith.cmpi eq, %c16_i32, %c0_i32 : i32
    %c1_i32 = arith.constant 1 : i32
    %14 = arith.select %13, %c1_i32, %c16_i32 : i32
    %15 = vector.broadcast %14 : i32 to vector<1x256xi32>
    %16 = arith.remsi %12, %15 : vector<1x256xi32>
    %c0_i32_12 = arith.constant 0 : i32
    %17 = vector.broadcast %c0_i32_12 : i32 to vector<1x256xi32>
    %18 = arith.cmpi ne, %16, %17 : vector<1x256xi32>
    %c0_i32_13 = arith.constant 0 : i32
    %19 = vector.broadcast %c0_i32_13 : i32 to vector<1x256xi32>
    %20 = arith.cmpi slt, %16, %19 : vector<1x256xi32>
    %c0_i32_14 = arith.constant 0 : i32
    %21 = arith.cmpi slt, %14, %c0_i32_14 : i32
    %22 = vector.broadcast %21 : i1 to vector<1x256xi1>
    %23 = vector.broadcast %22 : vector<1x256xi1> to vector<1x256xi1>
    %24 = arith.xori %20, %23 : vector<1x256xi1>
    %25 = arith.andi %24, %18 : vector<1x256xi1>
    %26 = vector.broadcast %14 : i32 to vector<1x256xi32>
    %27 = arith.addi %16, %26 : vector<1x256xi32>
    %28 = arith.select %25, %27, %16 : vector<1x256xi1>, vector<1x256xi32>
    %c16_i32_15 = arith.constant 16 : i32
    %29 = vector.broadcast %c16_i32_15 : i32 to vector<1x256xi32>
    %30 = arith.cmpi slt, %12, %29 : vector<1x256xi32>
    %c240_i32 = arith.constant 240 : i32
    %31 = vector.broadcast %c240_i32 : i32 to vector<1x256xi32>
    %32 = arith.cmpi sge, %12, %31 : vector<1x256xi32>
    %c1_i32_16 = arith.constant 1 : i32
    %33 = vector.broadcast %c1_i32_16 : i32 to vector<1x256xi32>
    %34 = arith.cmpi slt, %28, %33 : vector<1x256xi32>
    %c15_i32 = arith.constant 15 : i32
    %35 = vector.broadcast %c15_i32 : i32 to vector<1x256xi32>
    %36 = arith.cmpi sge, %28, %35 : vector<1x256xi32>
    %c0_17 = arith.constant 0 : index
    %c111 = arith.constant 111 : index
    %37 = vector.load %arg8[%c0_17, %c111] : memref<4x512xf32, #tpu.memory_space<vmem>>, vector<4x256xf32>
    %38 = arith.ori %30, %34 : vector<1x256xi1>
    %cst = arith.constant 0.000000e+00 : f32
    %39 = vector.shape_cast %38 : vector<1x256xi1> to vector<1x256xi1>
    %40 = vector.broadcast %39 : vector<1x256xi1> to vector<4x256xi1>
    %41 = vector.broadcast %cst : f32 to vector<4x256xf32>
    %42 = arith.select %40, %41, %37 : vector<4x256xi1>, vector<4x256xf32>
    %c0_18 = arith.constant 0 : index
    %c0_19 = arith.constant 0 : index
    %43 = vector.load %arg9[%c0_18, %c0_19] : memref<72x256xf32, #tpu.memory_space<vmem>>, vector<4x256xf32>
    tpu.vector_store %arg9[%c0_18, %c0_19], %42 {strides = array<i32>} : memref<72x256xf32, #tpu.memory_space<vmem>>, vector<4x256xf32>,
    %cst_20 = arith.constant 0.000000e+00 : f32
    %44 = vector.broadcast %cst_20 : f32 to vector<4x256xf32>
    %c4 = arith.constant 4 : index
    %c0_21 = arith.constant 0 : index
    %45 = vector.load %arg9[%c4, %c0_21] : memref<72x256xf32, #tpu.memory_space<vmem>>, vector<4x256xf32>
    tpu.vector_store %arg9[%c4, %c0_21], %44 {strides = array<i32>} : memref<72x256xf32, #tpu.memory_space<vmem>>, vector<4x256xf32>,
    %c0_22 = arith.constant 0 : index
    %c112 = arith.constant 112 : index
    %46 = vector.load %arg8[%c0_22, %c112] : memref<4x512xf32, #tpu.memory_space<vmem>>, vector<4x256xf32>
    %cst_23 = arith.constant 0.000000e+00 : f32
    %47 = vector.shape_cast %30 : vector<1x256xi1> to vector<1x256xi1>
    %48 = vector.broadcast %47 : vector<1x256xi1> to vector<4x256xi1>
    %49 = vector.broadcast %cst_23 : f32 to vector<4x256xf32>
    %50 = arith.select %48, %49, %46 : vector<4x256xi1>, vector<4x256xf32>
    %c8 = arith.constant 8 : index
    %c0_24 = arith.constant 0 : index
    %51 = vector.load %arg9[%c8, %c0_24] : memref<72x256xf32, #tpu.memory_space<vmem>>, vector<4x256xf32>
    tpu.vector_store %arg9[%c8, %c0_24], %50 {strides = array<i32>} : memref<72x256xf32, #tpu.memory_space<vmem>>, vector<4x256xf32>,
    %cst_25 = arith.constant 0.000000e+00 : f32
    %52 = vector.broadcast %cst_25 : f32 to vector<4x256xf32>
    %c12 = arith.constant 12 : index
    %c0_26 = arith.constant 0 : index
    %53 = vector.load %arg9[%c12, %c0_26] : memref<72x256xf32, #tpu.memory_space<vmem>>, vector<4x256xf32>
    tpu.vector_store %arg9[%c12, %c0_26], %52 {strides = array<i32>} : memref<72x256xf32, #tpu.memory_space<vmem>>, vector<4x256xf32>,
    %c0_27 = arith.constant 0 : index
    %c113 = arith.constant 113 : index
    %54 = vector.load %arg8[%c0_27, %c113] : memref<4x512xf32, #tpu.memory_space<vmem>>, vector<4x256xf32>
    %55 = arith.ori %30, %36 : vector<1x256xi1>
    %cst_28 = arith.constant 0.000000e+00 : f32
    %56 = vector.shape_cast %55 : vector<1x256xi1> to vector<1x256xi1>
    %57 = vector.broadcast %56 : vector<1x256xi1> to vector<4x256xi1>
    %58 = vector.broadcast %cst_28 : f32 to vector<4x256xf32>
    %59 = arith.select %57, %58, %54 : vector<4x256xi1>, vector<4x256xf32>
    %c16 = arith.constant 16 : index
    %c0_29 = arith.constant 0 : index
    %60 = vector.load %arg9[%c16, %c0_29] : memref<72x256xf32, #tpu.memory_space<vmem>>, vector<4x256xf32>
    tpu.vector_store %arg9[%c16, %c0_29], %59 {strides = array<i32>} : memref<72x256xf32, #tpu.memory_space<vmem>>, vector<4x256xf32>,
    %cst_30 = arith.constant 0.000000e+00 : f32
    %61 = vector.broadcast %cst_30 : f32 to vector<4x256xf32>
    %c20 = arith.constant 20 : index
    %c0_31 = arith.constant 0 : index
    %62 = vector.load %arg9[%c20, %c0_31] : memref<72x256xf32, #tpu.memory_space<vmem>>, vector<4x256xf32>
    tpu.vector_store %arg9[%c20, %c0_31], %61 {strides = array<i32>} : memref<72x256xf32, #tpu.memory_space<vmem>>, vector<4x256xf32>,
    %c0_32 = arith.constant 0 : index
    %c127 = arith.constant 127 : index
    %63 = vector.load %arg8[%c0_32, %c127] : memref<4x512xf32, #tpu.memory_space<vmem>>, vector<4x256xf32>
    %cst_33 = arith.constant 0.000000e+00 : f32
    %64 = vector.shape_cast %34 : vector<1x256xi1> to vector<1x256xi1>
    %65 = vector.broadcast %64 : vector<1x256xi1> to vector<4x256xi1>
    %66 = vector.broadcast %cst_33 : f32 to vector<4x256xf32>
    %67 = arith.select %65, %66, %63 : vector<4x256xi1>, vector<4x256xf32>
    %c24 = arith.constant 24 : index
    %c0_34 = arith.constant 0 : index
    %68 = vector.load %arg9[%c24, %c0_34] : memref<72x256xf32, #tpu.memory_space<vmem>>, vector<4x256xf32>
    tpu.vector_store %arg9[%c24, %c0_34], %67 {strides = array<i32>} : memref<72x256xf32, #tpu.memory_space<vmem>>, vector<4x256xf32>,
    %cst_35 = arith.constant 0.000000e+00 : f32
    %69 = vector.broadcast %cst_35 : f32 to vector<4x256xf32>
    %c28 = arith.constant 28 : index
    %c0_36 = arith.constant 0 : index
    %70 = vector.load %arg9[%c28, %c0_36] : memref<72x256xf32, #tpu.memory_space<vmem>>, vector<4x256xf32>
    tpu.vector_store %arg9[%c28, %c0_36], %69 {strides = array<i32>} : memref<72x256xf32, #tpu.memory_space<vmem>>, vector<4x256xf32>,
    %c0_37 = arith.constant 0 : index
    %c128_38 = arith.constant 128 : index
    %71 = vector.load %arg8[%c0_37, %c128_38] : memref<4x512xf32, #tpu.memory_space<vmem>>, vector<4x256xf32>
    %c32 = arith.constant 32 : index
    %c0_39 = arith.constant 0 : index
    %72 = vector.load %arg9[%c32, %c0_39] : memref<72x256xf32, #tpu.memory_space<vmem>>, vector<4x256xf32>
    tpu.vector_store %arg9[%c32, %c0_39], %71 {strides = array<i32>} : memref<72x256xf32, #tpu.memory_space<vmem>>, vector<4x256xf32>,
    %cst_40 = arith.constant 0.000000e+00 : f32
    %73 = vector.broadcast %cst_40 : f32 to vector<4x256xf32>
    %c36 = arith.constant 36 : index
    %c0_41 = arith.constant 0 : index
    %74 = vector.load %arg9[%c36, %c0_41] : memref<72x256xf32, #tpu.memory_space<vmem>>, vector<4x256xf32>
    tpu.vector_store %arg9[%c36, %c0_41], %73 {strides = array<i32>} : memref<72x256xf32, #tpu.memory_space<vmem>>, vector<4x256xf32>,
    %c0_42 = arith.constant 0 : index
    %c129 = arith.constant 129 : index
    %75 = vector.load %arg8[%c0_42, %c129] : memref<4x512xf32, #tpu.memory_space<vmem>>, vector<4x256xf32>
    %cst_43 = arith.constant 0.000000e+00 : f32
    %76 = vector.shape_cast %36 : vector<1x256xi1> to vector<1x256xi1>
    %77 = vector.broadcast %76 : vector<1x256xi1> to vector<4x256xi1>
    %78 = vector.broadcast %cst_43 : f32 to vector<4x256xf32>
    %79 = arith.select %77, %78, %75 : vector<4x256xi1>, vector<4x256xf32>
    %c40 = arith.constant 40 : index
    %c0_44 = arith.constant 0 : index
    %80 = vector.load %arg9[%c40, %c0_44] : memref<72x256xf32, #tpu.memory_space<vmem>>, vector<4x256xf32>
    tpu.vector_store %arg9[%c40, %c0_44], %79 {strides = array<i32>} : memref<72x256xf32, #tpu.memory_space<vmem>>, vector<4x256xf32>,
    %cst_45 = arith.constant 0.000000e+00 : f32
    %81 = vector.broadcast %cst_45 : f32 to vector<4x256xf32>
    %c44 = arith.constant 44 : index
    %c0_46 = arith.constant 0 : index
    %82 = vector.load %arg9[%c44, %c0_46] : memref<72x256xf32, #tpu.memory_space<vmem>>, vector<4x256xf32>
    tpu.vector_store %arg9[%c44, %c0_46], %81 {strides = array<i32>} : memref<72x256xf32, #tpu.memory_space<vmem>>, vector<4x256xf32>,
    %c0_47 = arith.constant 0 : index
    %c143 = arith.constant 143 : index
    %83 = vector.load %arg8[%c0_47, %c143] : memref<4x512xf32, #tpu.memory_space<vmem>>, vector<4x256xf32>
    %84 = arith.ori %32, %34 : vector<1x256xi1>
    %cst_48 = arith.constant 0.000000e+00 : f32
    %85 = vector.shape_cast %84 : vector<1x256xi1> to vector<1x256xi1>
    %86 = vector.broadcast %85 : vector<1x256xi1> to vector<4x256xi1>
    %87 = vector.broadcast %cst_48 : f32 to vector<4x256xf32>
    %88 = arith.select %86, %87, %83 : vector<4x256xi1>, vector<4x256xf32>
    %c48 = arith.constant 48 : index
    %c0_49 = arith.constant 0 : index
    %89 = vector.load %arg9[%c48, %c0_49] : memref<72x256xf32, #tpu.memory_space<vmem>>, vector<4x256xf32>
    tpu.vector_store %arg9[%c48, %c0_49], %88 {strides = array<i32>} : memref<72x256xf32, #tpu.memory_space<vmem>>, vector<4x256xf32>,
    %cst_50 = arith.constant 0.000000e+00 : f32
    %90 = vector.broadcast %cst_50 : f32 to vector<4x256xf32>
    %c52 = arith.constant 52 : index
    %c0_51 = arith.constant 0 : index
    %91 = vector.load %arg9[%c52, %c0_51] : memref<72x256xf32, #tpu.memory_space<vmem>>, vector<4x256xf32>
    tpu.vector_store %arg9[%c52, %c0_51], %90 {strides = array<i32>} : memref<72x256xf32, #tpu.memory_space<vmem>>, vector<4x256xf32>,
    %c0_52 = arith.constant 0 : index
    %c144 = arith.constant 144 : index
    %92 = vector.load %arg8[%c0_52, %c144] : memref<4x512xf32, #tpu.memory_space<vmem>>, vector<4x256xf32>
    %cst_53 = arith.constant 0.000000e+00 : f32
    %93 = vector.shape_cast %32 : vector<1x256xi1> to vector<1x256xi1>
    %94 = vector.broadcast %93 : vector<1x256xi1> to vector<4x256xi1>
    %95 = vector.broadcast %cst_53 : f32 to vector<4x256xf32>
    %96 = arith.select %94, %95, %92 : vector<4x256xi1>, vector<4x256xf32>
    %c56 = arith.constant 56 : index
    %c0_54 = arith.constant 0 : index
    %97 = vector.load %arg9[%c56, %c0_54] : memref<72x256xf32, #tpu.memory_space<vmem>>, vector<4x256xf32>
    tpu.vector_store %arg9[%c56, %c0_54], %96 {strides = array<i32>} : memref<72x256xf32, #tpu.memory_space<vmem>>, vector<4x256xf32>,
    %cst_55 = arith.constant 0.000000e+00 : f32
    %98 = vector.broadcast %cst_55 : f32 to vector<4x256xf32>
    %c60 = arith.constant 60 : index
    %c0_56 = arith.constant 0 : index
    %99 = vector.load %arg9[%c60, %c0_56] : memref<72x256xf32, #tpu.memory_space<vmem>>, vector<4x256xf32>
    tpu.vector_store %arg9[%c60, %c0_56], %98 {strides = array<i32>} : memref<72x256xf32, #tpu.memory_space<vmem>>, vector<4x256xf32>,
    %c0_57 = arith.constant 0 : index
    %c145 = arith.constant 145 : index
    %100 = vector.load %arg8[%c0_57, %c145] : memref<4x512xf32, #tpu.memory_space<vmem>>, vector<4x256xf32>
    %101 = arith.ori %32, %36 : vector<1x256xi1>
    %cst_58 = arith.constant 0.000000e+00 : f32
    %102 = vector.shape_cast %101 : vector<1x256xi1> to vector<1x256xi1>
    %103 = vector.broadcast %102 : vector<1x256xi1> to vector<4x256xi1>
    %104 = vector.broadcast %cst_58 : f32 to vector<4x256xf32>
    %105 = arith.select %103, %104, %100 : vector<4x256xi1>, vector<4x256xf32>
    %c64 = arith.constant 64 : index
    %c0_59 = arith.constant 0 : index
    %106 = vector.load %arg9[%c64, %c0_59] : memref<72x256xf32, #tpu.memory_space<vmem>>, vector<4x256xf32>
    tpu.vector_store %arg9[%c64, %c0_59], %105 {strides = array<i32>} : memref<72x256xf32, #tpu.memory_space<vmem>>, vector<4x256xf32>,
    %cst_60 = arith.constant 0.000000e+00 : f32
    %107 = vector.broadcast %cst_60 : f32 to vector<4x256xf32>
    %c68 = arith.constant 68 : index
    %c0_61 = arith.constant 0 : index
    %108 = vector.load %arg9[%c68, %c0_61] : memref<72x256xf32, #tpu.memory_space<vmem>>, vector<4x256xf32>
    tpu.vector_store %arg9[%c68, %c0_61], %107 {strides = array<i32>} : memref<72x256xf32, #tpu.memory_space<vmem>>, vector<4x256xf32>,
    %c0_62 = arith.constant 0 : index
    %c0_63 = arith.constant 0 : index
    %109 = vector.load %arg5[%c0_62, %c0_63] : memref<8x72xf32, #tpu.memory_space<vmem>>, vector<8x72xf32>
    %c0_64 = arith.constant 0 : index
    %c0_65 = arith.constant 0 : index
    %110 = vector.load %arg9[%c0_64, %c0_65] : memref<72x256xf32, #tpu.memory_space<vmem>>, vector<72x256xf32>
    %cst_66 = arith.constant dense<0.000000e+00> : vector<8x256xf32>
    %111 = tpu.matmul %109, %110, %cst_66 {dimension_numbers = #tpu.dot_dimension_numbers<[1], [0], [0], [1], [0, 0, 1, 1], [], []>} : vector<8x72xf32>, vector<72x256xf32>, vector<8x256xf32> -> vector<8x256xf32>
    %c0_67 = arith.constant 0 : index
    %c0_68 = arith.constant 0 : index
    %112 = vector.load %arg6[%c0_67, %c0_68] : memref<8x1xf32, #tpu.memory_space<vmem>>, vector<8x1xf32>
    %113 = vector.broadcast %112 : vector<8x1xf32> to vector<8x256xf32>
    %114 = arith.addf %111, %113 : vector<8x256xf32>
    %cst_69 = arith.constant 1.000000e+00 : f32
    %115 = vector.broadcast %cst_69 : f32 to vector<8x256xf32>
    %116 = arith.minimumf %114, %115 : vector<8x256xf32>
    %c0_70 = arith.constant 0 : index
    %c0_71 = arith.constant 0 : index
    %c0_72 = arith.constant 0 : index
    %117 = vector.load %arg7[%c0_70, %c0_71, %c0_72] : memref<1x8x256xf32, #tpu.memory_space<vmem>>, vector<1x8x256xf32>
    %118 = vector.shape_cast %117 : vector<1x8x256xf32> to vector<8x256xf32>
    %119 = vector.shape_cast %116 : vector<8x256xf32> to vector<1x8x256xf32>
    tpu.vector_store %arg7[%c0_70, %c0_71, %c0_72], %119 {strides = array<i32>} : memref<1x8x256xf32, #tpu.memory_space<vmem>>, vector<1x8x256xf32>,
    return
  }
  func.func @transform_0(%arg0: i32, %arg1: i32) -> (i32, i32, i32) {
    %c2_i32 = arith.constant 2 : i32
    %0 = arith.muli %arg1, %c2_i32 : i32
    %c1_i32 = arith.constant 1 : i32
    %1 = arith.subi %0, %c1_i32 : i32
    %c0_i32 = arith.constant 0 : i32
    %2 = arith.maxsi %1, %c0_i32 : i32
    %c0_i32_0 = arith.constant 0 : i32
    %c0_i32_1 = arith.constant 0 : i32
    return %arg0, %c0_i32_0, %2 : i32, i32, i32
  }
  func.func @transform_1(%arg0: i32, %arg1: i32) -> (i32, i32, i32) {
    %c0_i32 = arith.constant 0 : i32
    %c0_i32_0 = arith.constant 0 : i32
    return %arg0, %c0_i32, %arg1 : i32, i32, i32
  }
  func.func @transform_2(%arg0: i32, %arg1: i32) -> (i32, i32, i32) {
    %c1_i32 = arith.constant 1 : i32
    %0 = arith.addi %arg1, %c1_i32 : i32
    %c2_i32 = arith.constant 2 : i32
    %1 = arith.muli %0, %c2_i32 : i32
    %c1_i32_0 = arith.constant 1 : i32
    %2 = arith.minsi %1, %c1_i32_0 : i32
    %c0_i32 = arith.constant 0 : i32
    %c0_i32_1 = arith.constant 0 : i32
    return %arg0, %c0_i32, %2 : i32, i32, i32
  }
  func.func @transform_3(%arg0: i32, %arg1: i32) -> (i32, i32) {
    %c0_i32 = arith.constant 0 : i32
    %c0_i32_0 = arith.constant 0 : i32
    %c0_i32_1 = arith.constant 0 : i32
    return %c0_i32, %c0_i32_0 : i32, i32
  }
  func.func @transform_4(%arg0: i32, %arg1: i32) -> (i32, i32) {
    %c0_i32 = arith.constant 0 : i32
    %c0_i32_0 = arith.constant 0 : i32
    %c0_i32_1 = arith.constant 0 : i32
    return %c0_i32, %c0_i32_0 : i32, i32
  }
  func.func @transform_5(%arg0: i32, %arg1: i32) -> (i32, i32, i32) {
    %c0_i32 = arith.constant 0 : i32
    %c0_i32_0 = arith.constant 0 : i32
    return %arg0, %c0_i32, %arg1 : i32, i32, i32
  }
}

</mosaic_0001>

<bundles_post_ra>
// kernel: tpu_custom_call.1
= control target key start
LH: loop header
LB: loop body
LE: loop exit
PB: predicated region body
PF: predicated region fallthrough
CT: control target
= control target key end

     0   :  { %s1483_s0 = inlined_call_operand.hbm [shape: f32[2,4,256], index: 0, kind: input, shape index: {}]   ;;  %s1484_s1 = inlined_call_operand.hbm [shape: f32[2,4,256], index: 1, kind: input, shape index: {}]   ;;  %s1485_s2 = inlined_call_operand.hbm [shape: f32[2,4,256], index: 2, kind: input, shape index: {}]   ;;  %s1486_s3 = inlined_call_operand.vmem [shape: f32[8,72], index: 3, kind: input, shape index: {}]   ;;  %s1487_s4 = inlined_call_operand.vmem [shape: f32[8,1], index: 4, kind: input, shape index: {}]   ;;  %s1488_s5 = inlined_call_operand.hbm [shape: f32[2,8,256], index: 5, kind: output, shape index: {}]  }
   0x1   :  { %1494 = sst [smem:[#allocation19_spill]] %s1484_s1 }
   0x2   :  { %10 = vsyncpa [#allocation5], 0 }
   0x3   :  { %12 = vsyncpa [#allocation5 + $0x1], 0 }
   0x4   :  { %13 = vsyncpa [#allocation8], 0 }
   0x5   :  { %15 = vsyncpa [#allocation8 + $0x1], 0 }
   0x6   :  { %16 = vsyncpa [#allocation6], 0 }
   0x7   :  { %18 = vsyncpa [#allocation6 + $0x1], 0  ;;  %s1222_s18 = smov 0   ;;  %s1224_s19 = smov 0  }
   0x8   :  { %s1226_s20 = smov 0   ;;  %s1228_s21 = smov 0  }
   0x9   :  { %s1230_s22 = smov 0   ;;  %s1232_s23 = smov 0  }
   0xa LB: > { %1495 = sst [smem:[#allocation14_spill]] %s1164_s20  ;;  %s1253_s24 = sadd.s32 4294967295, %s1176_s23   ;;  %s1176_s23 = sphi %s1232_s23, %s24_s23   ;;  %s1172_s22 = sphi %s1230_s22, %s1520_s22   ;;  %s1168_s21 = sphi %s1228_s21, %s1519_s21   ;;  %s1164_s20 = sphi %s1226_s20, %s1518_s20   ;;  %s1160_s19 = sphi %s1224_s19, %s1522_s19   ;;  %s1156_s18 = sphi %s1222_s18, %s1521_s18  }
   0xb   : > { %1496 = sst [smem:[#allocation15_spill]] %s1172_s22  ;;  %s894_s25 = sadd.s32 4294967294, %s1176_s23  }
   0xc   : > { %1497 = sst [smem:[#allocation16_spill]] %s1176_s23  ;;  %s36_s26 = sadd.s32 1, %s1172_s22 }
   0xd   : > { %s53_s27 = sadd.s32 1, %s1164_s20  ;;  %p38_p0 = scmp.ge.s32.totalorder %s36_s26, 2 }
   0xe   : > { %p60_p1 = scmp.ne.s32.totalorder %s1164_s20, %s1160_s19  ;;  %p61_p2 = scmp.eq.s32.totalorder %s1176_s23, 0 }
   0xf   : > { %p66_p3 = scmp.ne.s32.totalorder %s1160_s19, %s1156_s18  ;;  %s1524_s26 = smov (%p38_p0, %s36_s26), 0 }
  0x10   : > { %1498 = sst [smem:[#allocation17_spill]] %s1524_s26  ;;  %p1265_p4 = por %p61_p2, %p60_p1 }
  0x11   : > { %p67_p5 = scmp.eq.s32.totalorder %s1253_s24, 0  ;;  %s48_s29 = ssub.s32 %s1172_s22, %s1524_s26 }
  0x12   : > { %p198_p6 = scmp.eq.s32.totalorder %s1253_s24, 1  ;;  %p51_p7 = scmp.eq.s32.totalorder %s48_s29, 0 }
  0x13   : > { %p1273_p8 = por %p67_p5, %p66_p3  ;;  %p204_p10 = scmp.eq.s32.totalorder %s894_s25, 1 }
  0x14   : > { %p1277_p9 = por %p198_p6, %p60_p1  ;;  %p945_p13 = scmp.lt.s32.totalorder %s1176_s23, 2 }
  0x15   : > { %s1282_s7 = scalar_select %p51_p7, %s1164_s20, %s53_s27  }
  0x16   : > { %p1284_p11 = por %p204_p10, %p66_p3  ;;  %s1291_s9 = sand.u32 1, %s1164_s20  }
  0x17   : > { %1502 = sst [smem:[#allocation18_spill]] %s1282_s7  ;;  %s1294_s10 = sshll.u32 %s1172_s22, 7 }
  0x18   : > { %s254_s11 = sand.u32 1, %s1176_s23   ;;  %p1299_p0 = pnand %p945_p13, %p1265_p4 }
  0x19   : > { %s900_s13 = sshll.u32 %s1291_s9, 3  ;;  %s1505_s1 = sld [smem:[#allocation19_spill]] }
  0x1a   : > { %s258_s17 = scalar_lea.vmem [#allocation7], %s900_s13  ;;  %p906_p1 = scmp.ge.s32.totalorder %s1176_s23, 1 }
  0x1b   : > { %s268_s25 = sshll.u32 %s258_s17, 4  ;;  %p297_p2 = scmp.lt.s32.totalorder %s1176_s23, 3  ;;  %s269_s25 = int_to_ptr.vmem [resolvable:$true] %s268_s25 }
  0x1c   : > { %s1310_s27 = scalar_lea.sflag [#allocation8], %s254_s11  ;;  %p1010_p3 = pneg %p1299_p0 }
  0x1d   : > { %s1021_s28 = scalar_lea.vmem %s269_s25, 128  ;;  %s1178_s29 = smov [#allocation7]  }
  0x1e   : > { %p1022_p4 = scmp.ne.s32.totalorder %s269_s25, %s1021_s28  ;;  %s1026_s26 = sshll.u32 %s1178_s29, 4  ;;  %s1027_s26 = int_to_ptr.vmem [resolvable:$false] %s1026_s26 }
  0x1f   : > { %s266_s16 = scalar_lea.hbm %s1505_s1, %s1294_s10  ;;  %s1028_s14 = scalar_lea.vmem %s1027_s26, 256 }
  0x20   : > { %p1024_p5 = pnand %p1022_p4, %p1010_p3  ;;  %p1029_p7 = scmp.lt.s32.totalorder %s269_s25, %s1027_s26 }
  0x21   : > { %p1030_p10 = scmp.lt.s32.totalorder %s1028_s14, %s1021_s28 }
  0x22   : > { %p1025_p6 = pneg %p1024_p5 }
  0x23   : > { %p1031_p13 = por %p1030_p10, %p1029_p7 }
  0x25   : > { %p1032_p12 = pnand %p1031_p13, %p1025_p6 }
  0x27   : > { %1035 = shalt.err (!%p1032_p12)
}
  0x28   : > { %937 = dma.hbm_to_vmem [thread:$0]  (!%p1299_p0), %s266_s16, 128, %s269_s25, %s1310_s27  }
  0x29   : > { %p1324_p4 = pnand %p906_p1, %p297_p2  ;;  %s897_s26 = sshll.u32 %s1291_s9, 2 }
  0x2a   : > { %s245_s17 = scalar_lea.hbm %s1483_s0, %s1294_s10  ;;  %s234_s28 = scalar_lea.vmem [#allocation4], %s897_s26 }
  0x2b   : > { %s247_s29 = sshll.u32 %s234_s28, 4  ;;  %s920_s14 = sadd.s32 64, %s1294_s10  ;;  %s248_s29 = int_to_ptr.vmem [resolvable:$true] %s247_s29 }
  0x2c   : > { %s1337_s7 = scalar_lea.hbm %s1485_s2, %s920_s14  ;;  %s231_s16 = scalar_lea.sflag [#allocation5], %s1291_s9 }
  0x2d   : > { %s1049_s25 = scalar_lea.vmem %s248_s29, 64  ;;  %s1179_s20 = smov [#allocation4]  }
  0x2e   : > { %p1050_p12 = scmp.ne.s32.totalorder %s248_s29, %s1049_s25  ;;  %s1054_s23 = sshll.u32 %s1179_s20, 4  ;;  %s1055_s23 = int_to_ptr.vmem [resolvable:$false] %s1054_s23 }
  0x2f   : > { %s1056_s13 = scalar_lea.vmem %s1055_s23, 128  ;;  %p1057_p5 = scmp.lt.s32.totalorder %s248_s29, %s1055_s23 }
  0x30   : > { %p1052_p1 = pnand %p1050_p12, %p1010_p3  ;;  %p1058_p6 = scmp.lt.s32.totalorder %s1056_s13, %s1049_s25 }
  0x32   : > { %p1053_p2 = pneg %p1052_p1  ;;  %p1059_p7 = por %p1058_p6, %p1057_p5 }
  0x34   : > { %p1060_p10 = pnand %p1059_p7, %p1053_p2 }
  0x36   : > { %1063 = shalt.err (!%p1060_p10)
}
  0x37   : > { %934 = dma.hbm_to_vmem [thread:$0]  (!%p1299_p0), %s245_s17, 64, %s248_s29, %s231_s16  }
  0x38   : > { %s279_s1 = scalar_lea.vmem [#allocation9], %s897_s26  ;;  %s1180_s20 = smov [#allocation9]  }
  0x39   : > { %s292_s22 = sshll.u32 %s279_s1, 4  ;;  %s1082_s10 = sshll.u32 %s1180_s20, 4  ;;  %s293_s22 = int_to_ptr.vmem [resolvable:$true] %s292_s22  ;;  %s1083_s10 = int_to_ptr.vmem [resolvable:$false] %s1082_s10 }
  0x3a   : > { %s1077_s9 = scalar_lea.vmem %s293_s22, 64  ;;  %s1084_s23 = scalar_lea.vmem %s1083_s10, 128 }
  0x3b   : > { %p1078_p13 = scmp.ne.s32.totalorder %s293_s22, %s1077_s9  ;;  %p1085_p5 = scmp.lt.s32.totalorder %s293_s22, %s1083_s10 }
  0x3c   : > { %p1086_p2 = scmp.lt.s32.totalorder %s1084_s23, %s1077_s9 }
  0x3d   : > { %p1080_p12 = pnand %p1078_p13, %p1010_p3 }
  0x3e   : > { %p1087_p6 = por %p1086_p2, %p1085_p5 }
  0x3f   : > { %p1081_p1 = pneg %p1080_p12 }
  0x41   : > { %p1088_p7 = pnand %p1087_p6, %p1081_p1 }
  0x43   : > { %1091 = shalt.err (!%p1088_p7)
}
  0x44   : > { %940 = dma.hbm_to_vmem [thread:$0]  (!%p1299_p0), %s1337_s7, 64, %s293_s22, %s1310_s27  }
  0x45   : > { %301 = sbr.rel (%p1324_p4) target bundleno = 471 (0x1d7), region = 40  ;;  %s1355_s26 = sand.u32 (!%p1324_p4), 1, %s1160_s19  }
  0x46   : > { %s907_s15 = sshll.u32 (!%p1324_p4), %s1355_s26, 2  ;;  %s304_s17 = scalar_lea.sflag (!%p1324_p4), [#allocation5], %s1355_s26 }
  0x47   : > { %s307_s28 = scalar_lea.vmem (!%p1324_p4), [#allocation4], %s907_s15 }
  0x4a   : > { %1143 = dma.done.wait (%p1273_p8), %s304_s17, 64  }
  0x4b   : > { %1145 = vsyncadd (%p1273_p8), %s304_s17, 4294967232  ;;  %s312_s7 = sand.u32 1, %s1253_s24   ;;  %s908_s12 = sshll.u32 %s1355_s26, 3 }
  0x4c   : > { %s313_s27 = scalar_lea.sflag [#allocation8], %s312_s7  ;;  %s316_s11 = scalar_lea.vmem [#allocation7], %s908_s12 }
  0x4d   : > { %1147 = dma.done.wait (%p1273_p8), %s313_s27, 192  }
  0x4e   : > { %1149 = vsyncadd (%p1273_p8), %s313_s27, 4294967104  ;;  %s325_s29 = scalar_lea.vmem [#allocation9], %s907_s15  ;;  %v374_v1 = vld [vmem:[%s316_s11] sm:$0xff]  ;;  %v372_v2 = vld [vmem:[%s307_s28] sm:$0xf]  ;;  %s1181_s14 = smov 111   ;;  %v378_v17 = vlaneseq }
  0x4f   : > { %v376_v0 = vld [vmem:[%s325_s29] sm:$0xf]  ;;  %375 = vst [vmem:[#allocation2 + $0x4] sm:$0xff] %v374_v1  ;;  %624 = vrot.lane.b32.xlu1 %v374_v1, %s1181_s14  ;;  %v623_v3 = vcombine.high %v374_v1, %v374_v1  ;;  %373 = vst [vmem:[#allocation2] sm:$0xf] %v372_v2  ;;  %v1182_v4 = vmov 0.0  }
  0x50   : > { %377 = vst [vmem:[#allocation2 + $0xc] sm:$0xf] %v376_v0  ;;  %529 = vst [vmem:[#allocation3 + $0x88] sm:$0xf] %v374_v1  ;;  %734 = vmatprep.mubr.f32.mxu0 %v1182_v4  ;;  %s1183_s24 = smov 112   ;;  %s1184_s30 = smov 113  }
  0x51   : > { %640 = vst [vmem:[#allocation3 + $0x60] sm:$0xf0] %v1182_v4  ;;  %443 = vst [vmem:[#allocation3] sm:$0xf0] %v1182_v4  ;;  %s1185_s16 = smov 127   ;;  %s1186_s25 = smov 1  }
  0x52   : > { %444 = vst [vmem:[#allocation3 + $0x38] sm:$0xf0] %v1182_v4  ;;  %469 = vst [vmem:[#allocation3 + $0x78] sm:$0xf0] %v1182_v4  ;;  %s1187_s13 = smov 15   ;;  %s1188_s1 = smov 16  }
  0x53   : > { %470 = vst [vmem:[#allocation3 + $0x58] sm:$0xf0] %v1182_v4  ;;  %497 = vst [vmem:[#allocation3 + $0x20] sm:$0xf0] %v1182_v4  ;;  %596 = vrot.lane.b32.xlu1 %v374_v1, %s1183_s24  ;;  %s1189_s22 = smov 17   ;;  %v1190_v15 = vmov 0  }
  0x54   : > { %498 = vst [vmem:[#allocation3 + $0x8] sm:$0xf0] %v1182_v4  ;;  %523 = vst [vmem:[#allocation3 + $0x70] sm:$0xf0] %v1182_v4  ;;  %1005 = vset.pattern.permute.xlu0 %v1190_v15  ;;  %v660_v16 = vld [vmem:[%s1487_s4] sm:$0xff]  ;;  %v1375_v19 = vand.u32 127, %v378_v17 }
  0x55   : > { %524 = vst [vmem:[#allocation3 + $0x80] sm:$0xf0] %v1182_v4  ;;  %531 = vst [vmem:[#allocation3 + $0x88] sm:$0xf0] %v1182_v4  ;;  %vm602_vm0 = vcmask 916480   ;;  %vm576_vm3 = vcmask 924672  }
  0x56   : > { %532 = vst [vmem:[#allocation3 + $0x40] sm:$0xf0] %v1182_v4  ;;  %557 = vst [vmem:[#allocation3 + $0x50] sm:$0xf0] %v1182_v4  ;;  %v500_v8 = vld [vmem:[#allocation2 + $0x8] sm:$0xf] }
  0x57   : > { %558 = vst [vmem:[#allocation3 + $0x28] sm:$0xf0] %v1182_v4  ;;  %585 = vst [vmem:[#allocation3 + $0x10] sm:$0xf0] %v1182_v4  ;;  %v614_v5 = vld [vmem:[#allocation2 + $0xc] sm:$0xf]  ;;  %598 = vrot.lane.b32.xlu1 %v623_v3, %s1183_s24 }
  0x58   : > { %586 = vst [vmem:[#allocation3 + $0x48] sm:$0xf0] %v1182_v4  ;;  %611 = vst [vmem:[#allocation3 + $0x30] sm:$0xf0] %v1182_v4  ;;  %628 = vrot.lane.b32.xlu0 %v614_v5, %s1181_s14  ;;  %v588_v6 = vld [vmem:[#allocation2 + $0xc] sm:$0xf] }
  0x59   : > { %612 = vst [vmem:[#allocation3 + $0x18] sm:$0xf0] %v1182_v4  ;;  %639 = vst [vmem:[#allocation3 + $0x68] sm:$0xf0] %v1182_v4  ;;  %v560_v7 = vld [vmem:[#allocation2 + $0xc] sm:$0xf] }
  0x5a   : > { %530 = vst [vmem:[#allocation3 + $0x40] sm:$0xf] %v623_v3  ;;  %v499_v9 = vld [vmem:[#allocation2] sm:$0xff]  ;;  %v534_v11 = vld [vmem:[#allocation2 + $0xc] sm:$0xf]  ;;  %v380_v21 = vadd.s32 128, %v1375_v19 }
  0x5b   : > { %572 = vrot.lane.b32.xlu1 %v623_v3, %s1184_s30  ;;  %v507_v10 = vcombine.high %v499_v9, %v499_v9  ;;  %v472_v12 = vld [vmem:[#allocation2 + $0x8] sm:$0xf]  ;;  %v389_v31 = vand.u32 15, %v1375_v19  ;;  %vm548_vm5 = vcmask 1039360   ;;  %vm630_vm9 = vcmask 908288   ;;  %s910_s15 = sshll.u32 %s1355_s26, 4 }
  0x5c   : > { %600 = vrot.lane.b32.xlu0 %v588_v6, %s1183_s24  ;;  %v446_v13 = vld [vmem:[#allocation2 + $0x8] sm:$0xf]  ;;  %v396_v24 = vand.u32 15, %v380_v21  ;;  %vm412_vm1 = vcmp.ge.s32.totalorder %v380_v21, 240  ;;  %vm409_vm11 = vcmp.lt.s32.totalorder %v1375_v19, 16  ;;  %vm514_vm12 = vcmask 7168  }
  0x5d   : > { %v418_v14 = vld [vmem:[#allocation2 + $0x8] sm:$0xf]  ;;  %vm1387_vm6 = vcmp.lt.s32.totalorder %v389_v31, 1  ;;  %vm1391_vm7 = vcmp.ge.s32.totalorder %v389_v31, 15  ;;  %vm488_vm13 = vcmask 121856   ;;  %vm460_vm15 = vcmask 130048  }
  0x5e   : > { %vm1378_vm2 = vcmp.lt.s32.totalorder %v396_v24, 1  ;;  %vm1395_vm8 = vcmp.ge.s32.totalorder %v396_v24, 15  ;;  %vm473_vm14 = vmor %vm409_vm11, %vm1391_vm7  ;;  %s921_s17 = sshll.u32 %s1168_s21, 8  ;;  %s361_s28 = scalar_lea.vmem [#allocation10], %s910_s15 }
  0x5f   : > { %544 = vrot.lane.b32.xlu1 %v623_v3, %s1185_s16  ;;  %vm562_vm4 = vmor %vm412_vm1, %vm1378_vm2  ;;  %s762_s7 = sshll.u32 %s361_s28, 4  ;;  %s760_s11 = scalar_lea.hbm %s1488_s5, %s921_s17  ;;  %s763_s7 = int_to_ptr.vmem [resolvable:$true] %s762_s7 }
  0x60   : > { %574 = vrot.lane.b32.xlu0 %v560_v7, %s1184_s30  ;;  %vm616_vm10 = vmor %vm412_vm1, %vm1395_vm8  ;;  %s746_s29 = scalar_lea.sflag [#allocation6], %s1355_s26  ;;  %s1191_s24 = smov [#allocation10]  }
  0x61   : > { %s1096_s21 = sshll.u32 %s1191_s24, 4  ;;  %s1097_s21 = int_to_ptr.vmem [resolvable:$false] %s1096_s21 }
  0x62   : > { %p1099_p4 = scmp.lt.s32.totalorder %s763_s7, %s1097_s21 }
  0x63   : > { %542 = vrot.lane.b32.xlu1 %v374_v1, %s1185_s16 }
  0x64   : > { %570 = vrot.lane.b32.xlu0 %v374_v1, %s1184_s30  ;;  %s1098_s30 = scalar_lea.vmem %s1097_s21, 512 }
  0x67   : > { %512 = vrot.lane.b32.xlu1 %v500_v8, %s1186_s25 }
  0x68   : > { %626 = vrot.lane.b32.xlu0 %v623_v3, %s1181_s14  ;;  %s1092_s14 = scalar_lea.vmem %s763_s7, 256 }
  0x69   : > { %p1093_p8 = scmp.ne.s32.totalorder %s763_s7, %s1092_s14  ;;  %p1100_p10 = scmp.lt.s32.totalorder %s1098_s30, %s1092_s14 }
  0x6b   : > { %484 = vrot.lane.b32.xlu1 %v507_v10, %s1187_s13  ;;  %p1094_p0 = pnand %p1093_p8, %p1277_p9  ;;  %p1101_p13 = por %p1100_p10, %p1099_p4 }
  0x6c   : > { %546 = vrot.lane.b32.xlu0 %v534_v11, %s1185_s16 }
  0x6d   : > { %p1095_p3 = pneg %p1094_p0 }
  0x6f   : > { %482 = vrot.lane.b32.xlu1 %v499_v9, %s1187_s13  ;;  %p1102_p12 = pnand %p1101_p13, %p1095_p3 }
  0x70   : > { %510 = vrot.lane.b32.xlu0 %v507_v10, %s1186_s25 }
  0x73   : > { %456 = vrot.lane.b32.xlu1 %v507_v10, %s1188_s1 }
  0x74   : > { %508 = vrot.lane.b32.xlu0 %v499_v9, %s1186_s25 }
  0x77   : > { %430 = vrot.lane.b32.xlu1 %v507_v10, %s1189_s22 }
  0x78   : > { %486 = vrot.lane.b32.xlu0 %v472_v12, %s1187_s13 }
  0x7b   : > { %428 = vrot.lane.b32.xlu1 %v499_v9, %s1189_s22 }
  0x7c   : > { %454 = vrot.lane.b32.xlu0 %v499_v9, %s1188_s1  ;;  %v651_v9 = vld [vmem:[#allocation3 + $0x40] sm:$0xff] }
  0x80   : > { %458 = vrot.lane.b32.xlu0 %v446_v13, %s1188_s1  ;;  %v650_v13 = vld [vmem:[#allocation3 + $0x88] sm:$0xff] }
  0x84   : > { %432 = vrot.lane.b32.xlu0 %v418_v14, %s1189_s22 }
  0x88   : > { %663 = vperm.xlu0 %1005, %v660_v16  }
  0xc1   : > { %v625_v18 = vpop.permute.xlu1 %624 }
  0xc5   : > { %v597_v20 = vpop.permute.xlu1 %596 }
  0xc9   : > { %v599_v23 = vpop.permute.xlu1 %598 }
  0xca   : > { %v629_v22 = vpop.permute.xlu0 %628  ;;  %v603_v25 = vsel %vm602_vm0, %v597_v20, %v599_v23 }
  0xcb   : > { %609 = vst [vmem:[#allocation3 + $0x30] sm:$0xf] %v603_v25 }
  0xcd   : > { %v573_v28 = vpop.permute.xlu1 %572 }
  0xce   : > { %v601_v26 = vpop.permute.xlu0 %600 }
  0xcf   : > { %v604_v29 = vsel %vm602_vm0, %v599_v23, %v601_v26  ;;  %vm434_vm0 = vcmask 138240  }
  0xd0   : > { %v608_v30 = vsel %vm412_vm1, 0.0, %v604_v29  ;;  %vm419_vm1 = vmor %vm409_vm11, %vm1387_vm6 }
  0xd1   : > { %610 = vst [vmem:[#allocation3 + $0x18] sm:$0xf] %v608_v30  ;;  %v545_v33 = vpop.permute.xlu1 %544 }
  0xd2   : > { %v575_v32 = vpop.permute.xlu0 %574  ;;  %v656_v3 = vld [vmem:[#allocation3 + $0x30] sm:$0xff] }
  0xd3   : > { %v578_v34 = vsel %vm576_vm3, %v573_v28, %v575_v32 }
  0xd4   : > { %v582_v35 = vsel %vm562_vm4, 0.0, %v578_v34  ;;  %v641_v34 = vld [vmem:[%s1486_s3] sm:$0xff] }
  0xd5   : > { %584 = vst [vmem:[#allocation3 + $0x48] sm:$0xf] %v582_v35  ;;  %v543_v40 = vpop.permute.xlu1 %542 }
  0xd6   : > { %v571_v38 = vpop.permute.xlu0 %570  ;;  %v549_v42 = vsel %vm548_vm5, %v543_v40, %v545_v33 }
  0xd7   : > { %v577_v41 = vsel %vm576_vm3, %v571_v38, %v573_v28  ;;  %v553_v44 = vsel %vm1391_vm7, 0.0, %v549_v42  ;;  %vm666_vm3 = vcmask 588800  }
  0xd8   : > { %v581_v43 = vsel %vm1387_vm6, 0.0, %v577_v41  ;;  %555 = vst [vmem:[#allocation3 + $0x50] sm:$0xf] %v553_v44  ;;  %v657_v0 = vld [vmem:[#allocation3 + $0x18] sm:$0xff] }
  0xd9   : > { %583 = vst [vmem:[#allocation3 + $0x10] sm:$0xf] %v581_v43  ;;  %v513_v46 = vpop.permute.xlu1 %512 }
  0xda   : > { %v627_v45 = vpop.permute.xlu0 %626 }
  0xdb   : > { %v631_v47 = vsel %vm630_vm9, %v625_v18, %v627_v45  ;;  %v632_v48 = vsel %vm630_vm9, %v627_v45, %v629_v22 }
  0xdc   : > { %v635_v49 = vsel %vm1391_vm7, 0.0, %v631_v47  ;;  %v636_v50 = vsel %vm616_vm10, 0.0, %v632_v48  ;;  %v655_v5 = vld [vmem:[#allocation3 + $0x48] sm:$0xff] }
  0xdd   : > { %637 = vst [vmem:[#allocation3 + $0x68] sm:$0xf] %v635_v49  ;;  %638 = vst [vmem:[#allocation3 + $0x60] sm:$0xf] %v636_v50  ;;  %v485_v52 = vpop.permute.xlu1 %484 }
  0xde   : > { %v547_v51 = vpop.permute.xlu0 %546 }
  0xdf   : > { %v550_v53 = vsel %vm548_vm5, %v545_v33, %v547_v51  ;;  %v652_v12 = vld [vmem:[#allocation3 + $0x50] sm:$0xff] }
  0xe0   : > { %v554_v54 = vsel %vm1395_vm8, 0.0, %v550_v53  ;;  %v654_v6 = vld [vmem:[#allocation3 + $0x10] sm:$0xff] }
  0xe1   : > { %556 = vst [vmem:[#allocation3 + $0x28] sm:$0xf] %v554_v54  ;;  %v483_v56 = vpop.permute.xlu1 %482 }
  0xe2   : > { %v511_v55 = vpop.permute.xlu0 %510  ;;  %v489_v58 = vsel %vm488_vm13, %v483_v56, %v485_v52 }
  0xe3   : > { %v516_v57 = vsel %vm514_vm12, %v511_v55, %v513_v46  ;;  %v493_v62 = vsel %vm473_vm14, 0.0, %v489_v58 }
  0xe4   : > { %v520_v59 = vsel %vm1378_vm2, 0.0, %v516_v57  ;;  %v659_v60 = vld [vmem:[#allocation3 + $0x60] sm:$0xff]  ;;  %v658_v61 = vld [vmem:[#allocation3 + $0x68] sm:$0xff]  ;;  %495 = vst [vmem:[#allocation3 + $0x20] sm:$0xf] %v493_v62 }
  0xe5   : > { %522 = vst [vmem:[#allocation3 + $0x80] sm:$0xf] %v520_v59  ;;  %684 = vmatprep.subr.mxu0 %v659_v60  ;;  %v457_v1 = vpop.permute.xlu1 %456 }
  0xe6   : > { %685 = vmatpush1.msra.mxu0 %v658_v61  ;;  %v509_v63 = vpop.permute.xlu0 %508 }
  0xe7   : > { %v515_v2 = vsel %vm514_vm12, %v509_v63, %v511_v55  ;;  %686 = vmatprep.subr.mxu0 %v657_v0 }
  0xe8   : > { %v519_v4 = vsel %vm1387_vm6, 0.0, %v515_v2  ;;  %687 = vmatpush1.msra.mxu0 %v656_v3  ;;  %v653_v8 = vld [vmem:[#allocation3 + $0x28] sm:$0xff] }
  0xe9   : > { %521 = vst [vmem:[#allocation3 + $0x70] sm:$0xf] %v519_v4  ;;  %688 = vmatprep.subr.mxu0 %v655_v5  ;;  %v431_v10 = vpop.permute.xlu1 %430 }
  0xea   : > { %689 = vmatpush1.msra.mxu0 %v654_v6  ;;  %v487_v7 = vpop.permute.xlu0 %486 }
  0xeb   : > { %v490_v11 = vsel %vm488_vm13, %v485_v52, %v487_v7  ;;  %690 = vmatprep.subr.mxu0 %v653_v8  ;;  %v646_v28 = vld [vmem:[#allocation3 + $0x20] sm:$0xff] }
  0xec   : > { %v494_v14 = vsel %vm1395_vm8, 0.0, %v490_v11  ;;  %691 = vmatpush1.msra.mxu0 %v652_v12  ;;  %v649_v16 = vld [vmem:[#allocation3 + $0x80] sm:$0xff] }
  0xed   : > { %496 = vst [vmem:[#allocation3 + $0x8] sm:$0xf] %v494_v14  ;;  %692 = vmatprep.subr.mxu0 %v651_v9  ;;  %v429_v17 = vpop.permute.xlu1 %428 }
  0xee   : > { %693 = vmatpush1.msra.mxu0 %v650_v13  ;;  %v455_v15 = vpop.permute.xlu0 %454  ;;  %v435_v20 = vsel %vm434_vm0, %v429_v17, %v431_v10 }
  0xef   : > { %v461_v18 = vsel %vm460_vm15, %v455_v15, %v457_v1  ;;  %694 = vmatprep.subr.mxu0 %v649_v16  ;;  %v439_v23 = vsel %vm419_vm1, 0.0, %v435_v20 }
  0xf0   : > { %v465_v21 = vsel %vm409_vm11, 0.0, %v461_v18  ;;  %v648_v22 = vld [vmem:[#allocation3 + $0x70] sm:$0xff]  ;;  %441 = vst [vmem:[#allocation3] sm:$0xf] %v439_v23 }
  0xf1   : > { %467 = vst [vmem:[#allocation3 + $0x78] sm:$0xf] %v465_v21  ;;  %695 = vmatpush1.msra.mxu0 %v648_v22 }
  0xf2   : > { %v459_v24 = vpop.permute.xlu0 %458 }
  0xf3   : > { %v462_v25 = vsel %vm460_vm15, %v457_v1, %v459_v24 }
  0xf4   : > { %468 = vst [vmem:[#allocation3 + $0x58] sm:$0xf] %v462_v25  ;;  %v647_v26 = vld [vmem:[#allocation3 + $0x8] sm:$0xff] }
  0xf5   : > { %696 = vmatprep.subr.mxu0 %v647_v26 }
  0xf6   : > { %697 = vmatpush1.msra.mxu0 %v646_v28  ;;  %v433_v29 = vpop.permute.xlu0 %432 }
  0xf7   : > { %v436_v30 = vsel %vm434_vm0, %v431_v10, %v433_v29  ;;  %v642_v35 = vld [vmem:[#allocation3] sm:$0xff] }
  0xf8   : > { %v440_v19 = vsel %vm1378_vm2, 0.0, %v436_v30  ;;  %v644_v32 = vld [vmem:[#allocation3 + $0x78] sm:$0xff] }
  0xf9   : > { %442 = vst [vmem:[#allocation3 + $0x38] sm:$0xf] %v440_v19 }
  0xfb   : > { %v645_v31 = vld [vmem:[#allocation3 + $0x58] sm:$0xff] }
  0xfc   : > { %698 = vmatprep.subr.mxu0 %v645_v31 }
  0xfd   : > { %699 = vmatpush1.msra.mxu0 %v644_v32 }
 0x100   : > { %v643_v33 = vld [vmem:[#allocation3 + $0x38] sm:$0xff] }
 0x101   : > { %700 = vmatprep.subr.mxu0 %v643_v33 }
 0x102   : > { %701 = vmatpush1.msra.mxu0 %v642_v35 }
 0x103   : > { %911 = vmatmul.mubr.msk.f32.vlgmr.msra.gmra.mxu0 %vm666_vm3, %v641_v34  ;;  %v664_v27 = vpop.permute.xlu0 %663 }
 0x1c3   : > { %v736_v36 = vpop.f32.mrf.mxu0 }
 0x1c4   : > { %v737_v37 = vadd.f32 %v736_v36, %v664_v27 }
 0x1c5   : > { %v738_v38 = vpop.f32.mrf.mxu0 }
 0x1c6   : > { %v741_v39 = vmin.f32 %v737_v37, 1.0  ;;  %v739_v40 = vadd.f32 %v738_v38, %v664_v27 }
 0x1c8   : > { %743 = vst [vmem:[%s361_s28] sm:$0xff] %v741_v39  ;;  %v742_v41 = vmin.f32 %v739_v40, 1.0 }
 0x1ca   : > { %744 = vst [vmem:[%s361_s28 + $0x8] sm:$0xff] %v742_v41 }
 0x1cb   : > { %1105 = shalt.err (!%p1102_p12)
}
 0x1cc   : > { %s1106_s16 = scalar_lea.hbm %s760_s11, 256  ;;  %s1110_s13 = scalar_lea.hbm %s1488_s5, 512 }
 0x1cd   : > { %p1107_p1 = scmp.ne.s32.totalorder %s760_s11, %s1106_s16  ;;  %p1111_p6 = scmp.lt.s32.totalorder %s760_s11, %s1488_s5 }
 0x1ce   : > { %p1112_p7 = scmp.lt.s32.totalorder %s1110_s13, %s1106_s16 }
 0x1cf   : > { %p1108_p5 = pnand %p1107_p1, %p1277_p9 }
 0x1d0   : > { %p1113_p8 = por %p1112_p7, %p1111_p6 }
 0x1d1   : > { %p1109_p2 = pneg %p1108_p5 }
 0x1d3   : > { %p1114_p0 = pnand %p1113_p8, %p1109_p2 }
 0x1d5   : > { %1117 = shalt.err (!%p1114_p0)
}
 0x1d6   : > { %929 = dma.vmem_to_hbm [thread:$0]  (%p1277_p9), %s763_s7, 256, %s760_s11, %s746_s29  }
 0x1d7 PF: > { %s1515_s9 = sld [smem:[#allocation16_spill]]  ;;  %s774_s20 = sand.u32 1, %s1156_s18  }
 0x1d8   : > { %s775_s10 = scalar_lea.sflag [#allocation6], %s774_s20 }
 0x1dd   : > { %p1516_p3 = scmp.ge.s32.totalorder %s1515_s9, 2 }
 0x1df   : > { %p942_p4 = pnand %p1516_p3, %p1284_p11 }
 0x1e1   : > { %p943_p10 = pneg %p942_p4 }
 0x1e3   : > { %1151 = dma.done.wait (%p943_p10), %s775_s10, 256  }
 0x1e4   : > { %1153 = vsyncadd (%p943_p10), %s775_s10, 4294967040  ;;  %s24_s23 = sadd.s32 1, %s1515_s9   ;;  %s1517_s15 = sld [smem:[#allocation14_spill]] }
 0x1e5   : > { %p21_p13 = scmp.ge.s32.totalorder %s24_s23, 4   ;;  %s1518_s20 = sld [smem:[#allocation18_spill]] }
 0x1e6   : > { %s1519_s21 = sld [smem:[#allocation15_spill]]  ;;  %s1521_s18 = smov %s1160_s19 }
 0x1e7   : > { %s1520_s22 = sld [smem:[#allocation17_spill]]  ;;  %23 = sbr.rel (!%p21_p13) target bundleno = 10 (0xa), region = 109 }
 0x1ea   : > { %s1522_s19 = smov %s1517_s15 }
 0x1ec   :  { %780 = vsyncpa [#allocation5], 1 }
 0x1ed   :  { %782 = vsyncpa [#allocation5 + $0x1], 1 }
 0x1ee   :  { %783 = vsyncpa [#allocation8], 1 }
 0x1ef   :  { %785 = vsyncpa [#allocation8 + $0x1], 1 }
 0x1f0   :  { %786 = vsyncpa [#allocation6], 1 }
 0x1f1   :  { %788 = vsyncpa [#allocation6 + $0x1], 1 }

</bundles_post_ra>
